<compile_context>
chip_gen: v7x
topology: tpu7x:2x2x1
jax: 0.10.0
libtpu: 0.0.40
codegen_flags: <defaults>
</compile_context>

<pallas_src>
import math

import jax
import jax.numpy as jnp
from jax.experimental import pallas as pl
from jax.experimental.pallas import tpu as pltpu


_ROWS_BLK = 8                           # one full f32 sublane group per block
_PIPELINE_BUDGET = 12 * 1024 * 1024     # bytes for (2 inputs x 2 pipeline bufs)
_VMEM_LIMIT = 32 * 1024 * 1024          # safe on v5e / v6e / v7x


def _round_up(x, m):
    return (x + m - 1) // m * m


def _dice_partial_kernel(x_ref, t_ref, inter_ref, xsum_ref, tsum_ref,
                         inter_acc, xsum_acc, tsum_acc):
    """Grid: (row_blocks, col_blocks). Axis 1 walks the reduction (columns).

    Per-row partial sums (intersection, sigmoid-sum, target-sum) accumulate in
    VMEM scratch across the column axis and are written out on the last step.
    """
    j = pl.program_id(1)

    @pl.when(j == 0)
    def _():
        inter_acc[...] = jnp.zeros_like(inter_acc)
        xsum_acc[...] = jnp.zeros_like(xsum_acc)
        tsum_acc[...] = jnp.zeros_like(tsum_acc)

    x = x_ref[...].astype(jnp.float32)
    t = t_ref[...].astype(jnp.float32)
    s = jax.nn.sigmoid(x)

    inter_acc[...] += jnp.sum(s * t, axis=-1, keepdims=True)
    xsum_acc[...] += jnp.sum(s, axis=-1, keepdims=True)
    tsum_acc[...] += jnp.sum(t, axis=-1, keepdims=True)

    @pl.when(j == pl.num_programs(1) - 1)
    def _():
        inter_ref[...] = inter_acc[...]
        xsum_ref[...] = xsum_acc[...]
        tsum_ref[...] = tsum_acc[...]


def _pad_value_for(dtype):
    # Logit pad value: large negative -> sigmoid == 0 exactly after f32 cast.
    if jnp.issubdtype(dtype, jnp.floating):
        return float(jnp.finfo(dtype).min)
    return int(jnp.iinfo(dtype).min)


def dice_loss(inputs, targets, smooth=1.0):
    """Matches torch DiceLoss.forward: sigmoid(inputs), sum over dims (1,2,3),
    dice = (2*inter + smooth)/(sum_in + sum_tg + smooth), mean(1 - dice)."""
    B = inputs.shape[0]
    N = 1
    for d in inputs.shape[1:]:
        N *= d

    x = inputs.reshape(B, N)
    t = targets.reshape(B, N)

    # --- sublane-filling row grouping: rows = B*g is a multiple of 8 --------
    g = 8 // math.gcd(B, 8)
    # Prefer >= 16 rows (two row blocks -> both v7x TensorCores) when each row
    # would still have plenty of columns.
    while B * g < 16 and (N + 2 * g - 1) // (2 * g) >= 1024:
        g *= 2
    rows = B * g

    # --- column tiling sized from the VMEM pipeline budget ------------------
    cols0 = -(-N // g)                      # ceil(N / g)
    cols = _round_up(max(cols0, 1), 128)

    bytes_per_col = 2 * _ROWS_BLK * (x.dtype.itemsize + t.dtype.itemsize)
    tk_budget = max(128, (_PIPELINE_BUDGET // bytes_per_col) // 128 * 128)

    if cols <= tk_budget:
        tk = cols
        cols_pad = cols
    else:
        tk = tk_budget
        cols_pad = _round_up(cols, tk)

    # --- pad + reshape to a lane-dense (rows, cols_pad) slab -----------------
    pad = g * cols_pad - N
    if pad > 0:
        x = jnp.pad(x, ((0, 0), (0, pad)),
                    constant_values=_pad_value_for(x.dtype))
        t = jnp.pad(t, ((0, 0), (0, pad)), constant_values=0)
    x = x.reshape(rows, cols_pad)
    t = t.reshape(rows, cols_pad)

    grid = (rows // _ROWS_BLK, cols_pad // tk)
    out_sds = jax.ShapeDtypeStruct((rows, 1), jnp.float32)

    inter, xsum, tsum = pl.pallas_call(
        _dice_partial_kernel,
        out_shape=(out_sds, out_sds, out_sds),
        grid_spec=pltpu.PrefetchScalarGridSpec(
            num_scalar_prefetch=0,
            grid=grid,
            in_specs=[
                pl.BlockSpec((_ROWS_BLK, tk), lambda i, j: (i, j)),
                pl.BlockSpec((_ROWS_BLK, tk), lambda i, j: (i, j)),
            ],
            out_specs=[
                pl.BlockSpec((_ROWS_BLK, 1), lambda i, j: (i, 0)),
                pl.BlockSpec((_ROWS_BLK, 1), lambda i, j: (i, 0)),
                pl.BlockSpec((_ROWS_BLK, 1), lambda i, j: (i, 0)),
            ],
            scratch_shapes=[
                pltpu.VMEM((_ROWS_BLK, 1), jnp.float32),  # intersection acc
                pltpu.VMEM((_ROWS_BLK, 1), jnp.float32),  # sigmoid-sum acc
                pltpu.VMEM((_ROWS_BLK, 1), jnp.float32),  # target-sum acc
            ],
        ),
        compiler_params=pltpu.CompilerParams(
            dimension_semantics=("parallel", "arbitrary"),
            vmem_limit_bytes=_VMEM_LIMIT,
        ),
    )(x, t)

    # Tiny JAX epilogue: combine the g rows of each sample, then dice + mean.
    inter_b = inter.reshape(B, g).sum(axis=1)
    xsum_b = xsum.reshape(B, g).sum(axis=1)
    tsum_b = tsum.reshape(B, g).sum(axis=1)

    smooth = jnp.float32(smooth)
    dice = (2.0 * inter_b + smooth) / (xsum_b + tsum_b + smooth)
    return jnp.mean(1.0 - dice)


def _dice_loss_ref(inputs, targets, smooth=1.0):
    B = inputs.shape[0]
    s = jax.nn.sigmoid(inputs.astype(jnp.float32)).reshape(B, -1)
    t = targets.astype(jnp.float32).reshape(B, -1)
    inter = jnp.sum(s * t, axis=1)
    dice = (2.0 * inter + smooth) / (jnp.sum(s, axis=1) + jnp.sum(t, axis=1) + smooth)
    return jnp.mean(1.0 - dice)


if __name__ == "__main__":
    key = jax.random.PRNGKey(0)
    k1, k2, k3, k4 = jax.random.split(key, 4)

    # Case 1: the module's canonical small shape (evenly divisible, f32).
    B, C, H, W = 2, 4, 16, 16
    inputs = jax.random.normal(k1, (B, C, H, W), dtype=jnp.float32)
    targets = (jax.random.uniform(k2, (B, C, H, W)) > 0.5).astype(jnp.float32)

    loss = jax.block_until_ready(dice_loss(inputs, targets, smooth=1.0))
    ref = _dice_loss_ref(inputs, targets, smooth=1.0)
    assert jnp.allclose(loss, ref, atol=1e-5, rtol=1e-5), (loss, ref)

    # Case 2: non-divisible spatial size + bf16 logits (exercises the padding
    # path and native-dtype streaming).
    B2, C2, H2, W2 = 3, 3, 17, 17
    inputs2 = jax.random.normal(k3, (B2, C2, H2, W2), dtype=jnp.bfloat16)
    targets2 = (jax.random.uniform(k4, (B2, C2, H2, W2)) > 0.5).astype(jnp.float32)

    loss2 = jax.block_until_ready(dice_loss(inputs2, targets2, smooth=1.0))
    ref2 = _dice_loss_ref(inputs2, targets2, smooth=1.0)
    assert jnp.allclose(loss2, ref2, atol=1e-4, rtol=1e-4), (loss2, ref2)

    print("KERNEL_OK")
</pallas_src>

<mosaic_0001>
module attributes {stable_mosaic.version = 11 : i64} {
  func.func @_dice_partial_kernel(%arg0: i32, %arg1: i32, %arg2: memref<8x256xf32, #tpu.memory_space<vmem>>, %arg3: memref<8x256xf32, #tpu.memory_space<vmem>>, %arg4: memref<8x1xf32, #tpu.memory_space<vmem>>, %arg5: memref<8x1xf32, #tpu.memory_space<vmem>>, %arg6: memref<8x1xf32, #tpu.memory_space<vmem>>, %arg7: memref<8x1xf32, #tpu.memory_space<vmem>>, %arg8: memref<8x1xf32, #tpu.memory_space<vmem>>, %arg9: memref<8x1xf32, #tpu.memory_space<vmem>>) attributes {dimension_semantics = [#tpu.dimension_semantics<parallel>, #tpu.dimension_semantics<arbitrary>], iteration_bounds = array<i64: 1, 1>, scalar_prefetch = 0 : i64, scratch_operands = 3 : i64, tpu.core_type = #tpu.core_type<tc>, window_params = [{transform_indices = @transform_0, window_bounds = array<i64: 8, 256>}, {transform_indices = @transform_1, window_bounds = array<i64: 8, 256>}, {transform_indices = @transform_2, window_bounds = array<i64: 8, 1>}, {transform_indices = @transform_3, window_bounds = array<i64: 8, 1>}, {transform_indices = @transform_4, window_bounds = array<i64: 8, 1>}]} {
    %c0_i32 = arith.constant 0 : i32
    %0 = arith.cmpi eq, %arg1, %c0_i32 : i32
    %1 = arith.extui %0 : i1 to i32
    %c0_i32_0 = arith.constant 0 : i32
    %2 = arith.cmpi ne, %1, %c0_i32_0 : i32
    scf.if %2 {
      %cst_21 = arith.constant 0.000000e+00 : f32
      %29 = vector.broadcast %cst_21 : f32 to vector<8x1xf32>
      %c0_22 = arith.constant 0 : index
      %c0_23 = arith.constant 0 : index
      %30 = vector.load %arg7[%c0_22, %c0_23] : memref<8x1xf32, #tpu.memory_space<vmem>>, vector<8x1xf32>
      tpu.vector_store %arg7[%c0_22, %c0_23], %29 {strides = array<i32>} : memref<8x1xf32, #tpu.memory_space<vmem>>, vector<8x1xf32>,
      %cst_24 = arith.constant 0.000000e+00 : f32
      %31 = vector.broadcast %cst_24 : f32 to vector<8x1xf32>
      %c0_25 = arith.constant 0 : index
      %c0_26 = arith.constant 0 : index
      %32 = vector.load %arg8[%c0_25, %c0_26] : memref<8x1xf32, #tpu.memory_space<vmem>>, vector<8x1xf32>
      tpu.vector_store %arg8[%c0_25, %c0_26], %31 {strides = array<i32>} : memref<8x1xf32, #tpu.memory_space<vmem>>, vector<8x1xf32>,
      %cst_27 = arith.constant 0.000000e+00 : f32
      %33 = vector.broadcast %cst_27 : f32 to vector<8x1xf32>
      %c0_28 = arith.constant 0 : index
      %c0_29 = arith.constant 0 : index
      %34 = vector.load %arg9[%c0_28, %c0_29] : memref<8x1xf32, #tpu.memory_space<vmem>>, vector<8x1xf32>
      tpu.vector_store %arg9[%c0_28, %c0_29], %33 {strides = array<i32>} : memref<8x1xf32, #tpu.memory_space<vmem>>, vector<8x1xf32>,
    } else {
    }
    %c0 = arith.constant 0 : index
    %c0_1 = arith.constant 0 : index
    %3 = vector.load %arg2[%c0, %c0_1] : memref<8x256xf32, #tpu.memory_space<vmem>>, vector<8x256xf32>
    %c0_2 = arith.constant 0 : index
    %c0_3 = arith.constant 0 : index
    %4 = vector.load %arg3[%c0_2, %c0_3] : memref<8x256xf32, #tpu.memory_space<vmem>>, vector<8x256xf32>
    %5 = arith.negf %3 : vector<8x256xf32>
    %6 = math.exp %5 : vector<8x256xf32>
    %cst = arith.constant 1.000000e+00 : f32
    %7 = vector.broadcast %cst : f32 to vector<8x256xf32>
    %8 = arith.addf %7, %6 : vector<8x256xf32>
    %9 = arith.divf %7, %8 : vector<8x256xf32>
    %c0_4 = arith.constant 0 : index
    %c0_5 = arith.constant 0 : index
    %10 = vector.load %arg7[%c0_4, %c0_5] : memref<8x1xf32, #tpu.memory_space<vmem>>, vector<8x1xf32>
    %11 = arith.mulf %9, %4 : vector<8x256xf32>
    %cst_6 = arith.constant dense<0.000000e+00> : vector<8xf32>
    %12 = vector.multi_reduction <add>, %11, %cst_6 [1] : vector<8x256xf32> to vector<8xf32>
    %13 = vector.shape_cast %12 : vector<8xf32> to vector<8x1xf32>
    %14 = arith.addf %10, %13 : vector<8x1xf32>
    %c0_7 = arith.constant 0 : index
    %c0_8 = arith.constant 0 : index
    %15 = vector.load %arg7[%c0_7, %c0_8] : memref<8x1xf32, #tpu.memory_space<vmem>>, vector<8x1xf32>
    tpu.vector_store %arg7[%c0_7, %c0_8], %14 {strides = array<i32>} : memref<8x1xf32, #tpu.memory_space<vmem>>, vector<8x1xf32>,
    %c0_9 = arith.constant 0 : index
    %c0_10 = arith.constant 0 : index
    %16 = vector.load %arg8[%c0_9, %c0_10] : memref<8x1xf32, #tpu.memory_space<vmem>>, vector<8x1xf32>
    %cst_11 = arith.constant dense<0.000000e+00> : vector<8xf32>
    %17 = vector.multi_reduction <add>, %9, %cst_11 [1] : vector<8x256xf32> to vector<8xf32>
    %18 = vector.shape_cast %17 : vector<8xf32> to vector<8x1xf32>
    %19 = arith.addf %16, %18 : vector<8x1xf32>
    %c0_12 = arith.constant 0 : index
    %c0_13 = arith.constant 0 : index
    %20 = vector.load %arg8[%c0_12, %c0_13] : memref<8x1xf32, #tpu.memory_space<vmem>>, vector<8x1xf32>
    tpu.vector_store %arg8[%c0_12, %c0_13], %19 {strides = array<i32>} : memref<8x1xf32, #tpu.memory_space<vmem>>, vector<8x1xf32>,
    %c0_14 = arith.constant 0 : index
    %c0_15 = arith.constant 0 : index
    %21 = vector.load %arg9[%c0_14, %c0_15] : memref<8x1xf32, #tpu.memory_space<vmem>>, vector<8x1xf32>
    %cst_16 = arith.constant dense<0.000000e+00> : vector<8xf32>
    %22 = vector.multi_reduction <add>, %4, %cst_16 [1] : vector<8x256xf32> to vector<8xf32>
    %23 = vector.shape_cast %22 : vector<8xf32> to vector<8x1xf32>
    %24 = arith.addf %21, %23 : vector<8x1xf32>
    %c0_17 = arith.constant 0 : index
    %c0_18 = arith.constant 0 : index
    %25 = vector.load %arg9[%c0_17, %c0_18] : memref<8x1xf32, #tpu.memory_space<vmem>>, vector<8x1xf32>
    tpu.vector_store %arg9[%c0_17, %c0_18], %24 {strides = array<i32>} : memref<8x1xf32, #tpu.memory_space<vmem>>, vector<8x1xf32>,
    %c0_i32_19 = arith.constant 0 : i32
    %26 = arith.cmpi eq, %arg1, %c0_i32_19 : i32
    %27 = arith.extui %26 : i1 to i32
    %c0_i32_20 = arith.constant 0 : i32
    %28 = arith.cmpi ne, %27, %c0_i32_20 : i32
    scf.if %28 {
      %c0_21 = arith.constant 0 : index
      %c0_22 = arith.constant 0 : index
      %29 = vector.load %arg7[%c0_21, %c0_22] : memref<8x1xf32, #tpu.memory_space<vmem>>, vector<8x1xf32>
      %c0_23 = arith.constant 0 : index
      %c0_24 = arith.constant 0 : index
      %30 = vector.load %arg4[%c0_23, %c0_24] : memref<8x1xf32, #tpu.memory_space<vmem>>, vector<8x1xf32>
      tpu.vector_store %arg4[%c0_23, %c0_24], %29 {strides = array<i32>} : memref<8x1xf32, #tpu.memory_space<vmem>>, vector<8x1xf32>,
      %c0_25 = arith.constant 0 : index
      %c0_26 = arith.constant 0 : index
      %31 = vector.load %arg8[%c0_25, %c0_26] : memref<8x1xf32, #tpu.memory_space<vmem>>, vector<8x1xf32>
      %c0_27 = arith.constant 0 : index
      %c0_28 = arith.constant 0 : index
      %32 = vector.load %arg5[%c0_27, %c0_28] : memref<8x1xf32, #tpu.memory_space<vmem>>, vector<8x1xf32>
      tpu.vector_store %arg5[%c0_27, %c0_28], %31 {strides = array<i32>} : memref<8x1xf32, #tpu.memory_space<vmem>>, vector<8x1xf32>,
      %c0_29 = arith.constant 0 : index
      %c0_30 = arith.constant 0 : index
      %33 = vector.load %arg9[%c0_29, %c0_30] : memref<8x1xf32, #tpu.memory_space<vmem>>, vector<8x1xf32>
      %c0_31 = arith.constant 0 : index
      %c0_32 = arith.constant 0 : index
      %34 = vector.load %arg6[%c0_31, %c0_32] : memref<8x1xf32, #tpu.memory_space<vmem>>, vector<8x1xf32>
      tpu.vector_store %arg6[%c0_31, %c0_32], %33 {strides = array<i32>} : memref<8x1xf32, #tpu.memory_space<vmem>>, vector<8x1xf32>,
    } else {
    }
    return
  }
  func.func @transform_0(%arg0: i32, %arg1: i32) -> (i32, i32) {
    %c0_i32 = arith.constant 0 : i32
    return %arg0, %arg1 : i32, i32
  }
  func.func @transform_1(%arg0: i32, %arg1: i32) -> (i32, i32) {
    %c0_i32 = arith.constant 0 : i32
    return %arg0, %arg1 : i32, i32
  }
  func.func @transform_2(%arg0: i32, %arg1: i32) -> (i32, i32) {
    %c0_i32 = arith.constant 0 : i32
    %c0_i32_0 = arith.constant 0 : i32
    return %arg0, %c0_i32 : i32, i32
  }
  func.func @transform_3(%arg0: i32, %arg1: i32) -> (i32, i32) {
    %c0_i32 = arith.constant 0 : i32
    %c0_i32_0 = arith.constant 0 : i32
    return %arg0, %c0_i32 : i32, i32
  }
  func.func @transform_4(%arg0: i32, %arg1: i32) -> (i32, i32) {
    %c0_i32 = arith.constant 0 : i32
    %c0_i32_0 = arith.constant 0 : i32
    return %arg0, %c0_i32 : i32, i32
  }
}

</mosaic_0001>

<bundles_post_ra>
// kernel: tpu_custom_call.1
= control target key start
LH: loop header
LB: loop body
LE: loop exit
PB: predicated region body
PF: predicated region fallthrough
CT: control target
= control target key end

     0   :  { %10 = vsyncpa [#allocation6], 0  ;;  %s237_s0 = inlined_call_operand.hbm [shape: f32[8,256], index: 0, kind: input, shape index: {}]   ;;  %s238_s1 = inlined_call_operand.hbm [shape: f32[8,256], index: 1, kind: input, shape index: {}]   ;;  %s239_s2 = inlined_call_operand.vmem [shape: f32[8,1], index: 2, kind: output, shape index: {0}]   ;;  %s240_s3 = inlined_call_operand.vmem [shape: f32[8,1], index: 3, kind: output, shape index: {1}]   ;;  %s241_s4 = inlined_call_operand.vmem [shape: f32[8,1], index: 4, kind: output, shape index: {2}]  }
   0x1   :  { %11 = vsyncpa [#allocation8], 0  ;;  %s167_s15 = smov [#allocation5]   ;;  %s168_s17 = smov [#allocation7]  }
   0x2   :  { %s18_s16 = sshll.u32 %s167_s15, 4  ;;  %s28_s18 = sshll.u32 %s168_s17, 4  ;;  %s19_s16 = int_to_ptr.vmem [resolvable:$true] %s18_s16  ;;  %s29_s18 = int_to_ptr.vmem [resolvable:$true] %s28_s18 }
   0x3   :  { %s119_s21 = scalar_lea.hbm %s237_s0, 256 }
   0x4   :  { %p120_p0 = scmp.ne.s32.totalorder %s237_s0, %s119_s21  ;;  %p123_p1 = scmp.lt.u32.totalorder %s119_s21, %s237_s0 }
   0x6   :  { %p125_p2 = pnand %p123_p1, %p120_p0 }
   0x8   :  { %128 = shalt.err (!%p125_p2)
}
   0x9   :  { %s129_s26 = scalar_lea.vmem %s19_s16, 256  ;;  %p134_p4 = scmp.lt.s32.totalorder %s19_s16, %s19_s16 }
   0xa   :  { %p130_p3 = scmp.ne.s32.totalorder %s19_s16, %s129_s26  ;;  %p135_p5 = scmp.lt.s32.totalorder %s129_s26, %s129_s26 }
   0xc   :  { %p136_p6 = por %p135_p5, %p134_p4 }
   0xe   :  { %p137_p7 = pnand %p136_p6, %p130_p3 }
  0x10   :  { %140 = shalt.err (!%p137_p7)
}
  0x11   :  { %21 = dma.hbm_to_vmem [thread:$0]  %s237_s0, 256, %s19_s16, [#allocation6]  }
  0x12   :  { %s141_s5 = scalar_lea.hbm %s238_s1, 256 }
  0x13   :  { %p142_p8 = scmp.ne.s32.totalorder %s238_s1, %s141_s5  ;;  %p145_p9 = scmp.lt.u32.totalorder %s141_s5, %s238_s1 }
  0x15   :  { %p147_p10 = pnand %p145_p9, %p142_p8 }
  0x17   :  { %150 = shalt.err (!%p147_p10)
}
  0x18   :  { %s151_s10 = scalar_lea.vmem %s29_s18, 256  ;;  %p156_p12 = scmp.lt.s32.totalorder %s29_s18, %s29_s18 }
  0x19   :  { %p152_p11 = scmp.ne.s32.totalorder %s29_s18, %s151_s10  ;;  %p157_p13 = scmp.lt.s32.totalorder %s151_s10, %s151_s10 }
  0x1b   :  { %p158_p0 = por %p157_p13, %p156_p12 }
  0x1d   :  { %p159_p1 = pnand %p158_p0, %p152_p11 }
  0x1f   :  { %162 = shalt.err (!%p159_p1)
}
  0x20   :  { %31 = dma.hbm_to_vmem [thread:$0]  %s238_s1, 256, %s29_s18, [#allocation8]  }
  0x21   :  { %163 = dma.done.wait [#allocation6], 256  }
  0x22   :  { %164 = vsyncadd [#allocation6], 4294967040 }
  0x23   :  { %165 = dma.done.wait [#allocation8], 256  }
  0x24   :  { %166 = vsyncadd [#allocation8], 4294967040  ;;  %vm42_vm0 = vcmask 7168   ;;  %v169_v0 = vmov 0.0   ;;  %v46_v1 = vld [vmem:[#allocation5] sm:$0xff]  ;;  %v47_v2 = vld [vmem:[#allocation5 + $0x8] sm:$0xff] }
  0x25   :  { %43 = vst.msk [vmem:[#allocation2] sm:$0xff] %vm42_vm0, %v169_v0  ;;  %44 = vst.msk [vmem:[#allocation3] sm:$0xff] %vm42_vm0, %v169_v0  ;;  %v48_v3 = vld [vmem:[#allocation7] sm:$0xff]  ;;  %v49_v4 = vld [vmem:[#allocation7 + $0x8] sm:$0xff]  ;;  %v106_v5 = vmul.f32 -1.442695, %v46_v1 }
  0x26   :  { %45 = vst.msk [vmem:[#allocation4] sm:$0xff] %vm42_vm0, %v169_v0  ;;  %v107_v6 = vmul.f32 -1.442695, %v47_v2  ;;  %v78_v7 = vadd.f32 %v49_v4, %v48_v3 }
  0x27   :  { %111 = vpow2.f32 %v106_v5 }
  0x28   :  { %113 = vpow2.f32 %v107_v6  ;;  %79 = vadd.xlane.f32.xlu1 %v78_v7 }
  0x2c   :  { %v62_v22 = vld [vmem:[#allocation2] sm:$0xff]  ;;  %v71_v25 = vld [vmem:[#allocation3] sm:$0xff] }
  0x2d   :  { %v77_v18 = vld [vmem:[#allocation4] sm:$0xff] }
  0x31   :  { %v112_v8 = vpop.eup %111 }
  0x32   :  { %v114_v9 = vpop.eup %113  ;;  %v56_v10 = vadd.f32 1.0, %v112_v8 }
  0x33   :  { %v57_v11 = vadd.f32 1.0, %v114_v9 }
  0x34   :  { %115 = vrcp.f32 %v56_v10 }
  0x35   :  { %117 = vrcp.f32 %v57_v11 }
  0x3e   :  { %v116_v12 = vpop.eup %115 }
  0x3f   :  { %v118_v13 = vpop.eup %117  ;;  %v63_v14 = vmul.f32 %v116_v12, %v48_v3 }
  0x40   :  { %v64_v15 = vmul.f32 %v118_v13, %v49_v4  ;;  %v72_v17 = vadd.f32 %v118_v13, %v116_v12 }
  0x42   :  { %v65_v16 = vadd.f32 %v64_v15, %v63_v14 }
  0x44   :  { %66 = vadd.xlane.f32.xlu0 %v65_v16 }
  0x48   :  { %73 = vadd.xlane.f32.xlu0 %v72_v17 }
  0xb5   :  { %v80_v19 = vpop.xlane.xlu1 %79 }
  0xb6   :  { %v81_v20 = vadd.f32 %v80_v19, %v77_v18 }
  0xb8   :  { %82 = vst.msk [vmem:[#allocation4] sm:$0xff] %vm42_vm0, %v81_v20 }
  0xbf   :  { %v90_v21 = vld [vmem:[#allocation4] sm:$0xff] }
  0xc0   :  { %91 = vst.msk [vmem:[%s241_s4] sm:$0xff] %vm42_vm0, %v90_v21 }
  0xd1   :  { %v67_v23 = vpop.xlane.xlu0 %66 }
  0xd2   :  { %v68_v24 = vadd.f32 %v67_v23, %v62_v22 }
  0xd4   :  { %70 = vst.msk [vmem:[#allocation2] sm:$0xff] %vm42_vm0, %v68_v24 }
  0xd5   :  { %v74_v26 = vpop.xlane.xlu0 %73 }
  0xd6   :  { %v75_v27 = vadd.f32 %v74_v26, %v71_v25 }
  0xd8   :  { %76 = vst.msk [vmem:[#allocation3] sm:$0xff] %vm42_vm0, %v75_v27 }
  0xdb   :  { %v86_v28 = vld [vmem:[#allocation2] sm:$0xff] }
  0xdc   :  { %87 = vst.msk [vmem:[%s239_s2] sm:$0xff] %vm42_vm0, %v86_v28 }
  0xdf   :  { %v88_v29 = vld [vmem:[#allocation3] sm:$0xff] }
  0xe0   :  { %89 = vst.msk [vmem:[%s240_s3] sm:$0xff] %vm42_vm0, %v88_v29 }
  0xe1   :  { %104 = vsyncpa [#allocation6], 1 }
  0xe2   :  { %105 = vsyncpa [#allocation8], 1 }

</bundles_post_ra>
